<compile_context>
chip_gen: v6e
topology: v6e:2x2x1
jax: 0.10.0
libtpu: 0.0.40
codegen_flags: <defaults>
</compile_context>

<pallas_src>
import functools

import jax
import jax.numpy as jnp
from jax.experimental import pallas as pl
from jax.experimental.pallas import tpu as pltpu

LANE = 128
NSPLIT_MAX = 2      # leading parallel axis (both TCs on v7x; no-op elsewhere)


def _tile_rows_for_device():
    """Generation-aware row-tile cap (rows of 128 lanes, f32)."""
    try:
        kind = jax.devices()[0].device_kind.lower()
    except Exception:
        return 2048
    if "v7" in kind or "7x" in kind:
        return 8192    # 4 MiB f32/input/block; 2 in x 2 buf = 16 MiB
    if "v6" in kind or "trillium" in kind:
        return 4096    # 2 MiB f32/input/block; 8 MiB double-buffered
    return 2048        # v5e & default: 1 MiB/input/block; 4 MiB double-buffered


def _dice_kernel(x_ref, t_ref, o_ref, acc_i, acc_s, *,
                 bps, num_blocks, tail_rows, tail_ragged, has_dup):
    i = pl.program_id(0)   # parallel split (megacore)
    j = pl.program_id(1)   # sequential block loop within the split

    @pl.when(j == 0)
    def _():
        acc_i[...] = jnp.zeros_like(acc_i)
        acc_s[...] = jnp.zeros_like(acc_s)

    def accumulate(valid_rows=None):
        x = jax.nn.sigmoid(x_ref[...].astype(jnp.float32))
        t = t_ref[...].astype(jnp.float32)
        if valid_rows is not None:
            # Only the single ragged tail block pays for this: rows past the
            # end of the (rows, 128) view are Pallas edge-padding garbage.
            r_idx = jax.lax.broadcasted_iota(jnp.int32, x.shape, 0)
            keep = r_idx < valid_rows
            x = jnp.where(keep, x, 0.0)
            t = jnp.where(keep, t, 0.0)
        # Steady state: VPU/XLU-only partial sums into (1, 128) accumulators.
        acc_i[...] += jnp.sum(x * t, axis=0, keepdims=True)
        acc_s[...] += jnp.sum(x + t, axis=0, keepdims=True)

    blk = i * bps + j      # global block index

    if tail_ragged:
        # Hot path: every block except the ragged tail (and any clamped
        # duplicate block) is iota/where-free.
        @pl.when((blk < num_blocks) & (blk != num_blocks - 1))
        def _():
            accumulate()

        @pl.when(blk == num_blocks - 1)
        def _():
            accumulate(valid_rows=tail_rows)
    elif has_dup:
        # Clamped duplicate blocks (uneven split across cores) contribute
        # nothing: skip their accumulation entirely.
        @pl.when(blk < num_blocks)
        def _():
            accumulate()
    else:
        accumulate()

    # Epilogue: one cross-lane reduce per quantity, written to SMEM output.
    @pl.when(j == pl.num_programs(1) - 1)
    def _():
        o_ref[0, 0] = jnp.sum(acc_i[...])
        o_ref[0, 1] = jnp.sum(acc_s[...])


def dice_loss(inputs, targets, smooth=1.0, *, tile_cap=None):
    """Pallas TPU DiceLoss. inputs/targets: any shape (e.g. NCHW), same numel."""
    n = int(inputs.size)
    assert int(targets.size) == n and n > 0
    x = inputs.reshape(-1)
    t = targets.reshape(-1)
    if not jnp.issubdtype(x.dtype, jnp.floating):
        x = x.astype(jnp.float32)

    rows = (n + LANE - 1) // LANE
    padded = rows * LANE
    if padded != n:
        # Minimal (<128 element) value-pad so the flat array forms a
        # (rows, 128) view WITHOUT needing any in-kernel lane mask:
        # sigmoid(most-negative) == 0 and target pad == 0 contribute nothing
        # to any of the sums.
        neg = jnp.finfo(x.dtype).min
        x = jnp.pad(x, (0, padded - n), constant_values=neg)
        t = jnp.pad(t, (0, padded - n), constant_values=0)
    x2 = x.reshape(rows, LANE)
    t2 = t.reshape(rows, LANE)

    if tile_cap is None:
        tile_cap = _tile_rows_for_device()
    tile_r = rows if rows <= tile_cap else tile_cap
    num_blocks = (rows + tile_r - 1) // tile_r
    nsplit = min(NSPLIT_MAX, num_blocks)
    bps = (num_blocks + nsplit - 1) // nsplit          # blocks per split
    has_dup = (nsplit * bps != num_blocks)             # uneven split
    tail_rows = rows - (num_blocks - 1) * tile_r       # valid rows, last block
    tail_ragged = (tail_rows != tile_r)

    def in_map(i, j):
        b = i * bps + j
        if has_dup:
            # Clamp overflow blocks to a valid DMA index; their contribution
            # is skipped in-kernel.
            b = jnp.minimum(b, num_blocks - 1)
        return (b, 0)

    # Explicit scoped-VMEM limit so 2 inputs x 2 pipeline buffers never trips
    # a generation's default (notably v5e's 16 MiB).
    blk_bytes = tile_r * LANE * (x2.dtype.itemsize + t2.dtype.itemsize)
    vmem_limit = int(max(2 * blk_bytes + (4 << 20), 16 << 20))

    cost = pl.CostEstimate(
        flops=8 * n,
        transcendentals=n,
        bytes_accessed=n * (x2.dtype.itemsize + t2.dtype.itemsize))

    partials = pl.pallas_call(
        functools.partial(_dice_kernel, bps=bps, num_blocks=num_blocks,
                          tail_rows=tail_rows, tail_ragged=tail_ragged,
                          has_dup=has_dup),
        out_shape=jax.ShapeDtypeStruct((nsplit, 2), jnp.float32),
        grid_spec=pltpu.PrefetchScalarGridSpec(
            num_scalar_prefetch=0,
            grid=(nsplit, bps),
            in_specs=[
                pl.BlockSpec((tile_r, LANE), in_map),
                pl.BlockSpec((tile_r, LANE), in_map),
            ],
            out_specs=pl.BlockSpec((1, 2), lambda i, j: (i, 0),
                                   memory_space=pltpu.SMEM),
            scratch_shapes=[pltpu.VMEM((1, LANE), jnp.float32)] * 2,
        ),
        # If a v7x profile shows one TensorCore idle, switch the first axis to
        # pltpu.CORE_PARALLEL.
        compiler_params=pltpu.CompilerParams(
            dimension_semantics=("parallel", "arbitrary"),
            vmem_limit_bytes=vmem_limit),
        cost_estimate=cost,
    )(x2, t2)

    inter = jnp.sum(partials[:, 0])
    denom = jnp.sum(partials[:, 1])            # sum(sigmoid(x)) + sum(t)
    dice = (2.0 * inter + float(smooth)) / (denom + float(smooth))
    return 1.0 - dice


def _dice_loss_ref(inputs, targets, smooth=1.0):
    x = jax.nn.sigmoid(inputs.astype(jnp.float32)).reshape(-1)
    t = targets.astype(jnp.float32).reshape(-1)
    inter = jnp.sum(x * t)
    dice = (2.0 * inter + smooth) / (jnp.sum(x) + jnp.sum(t) + smooth)
    return 1.0 - dice


if __name__ == "__main__":
    key = jax.random.PRNGKey(0)
    k1, k2, k3, k4, k5, k6 = jax.random.split(key, 6)

    # 1) Segmentation-style logits / binary masks, NCHW (lane-aligned numel).
    inputs = jax.random.normal(k1, (2, 4, 16, 16), dtype=jnp.float32)
    targets = (jax.random.uniform(k2, (2, 4, 16, 16)) > 0.5).astype(jnp.float32)
    loss = dice_loss(inputs, targets, smooth=1.0)
    jax.block_until_ready(loss)
    ref = _dice_loss_ref(inputs, targets, smooth=1.0)
    assert jnp.allclose(loss, ref, rtol=1e-5, atol=1e-5), (loss, ref)

    # 2) Lane-misaligned numel -> exercises the value-pad path (no mask).
    inputs2 = jax.random.normal(k3, (3, 7, 11), dtype=jnp.float32)
    targets2 = (jax.random.uniform(k4, (3, 7, 11)) > 0.5).astype(jnp.float32)
    loss2 = dice_loss(inputs2, targets2, smooth=1.0)
    jax.block_until_ready(loss2)
    ref2 = _dice_loss_ref(inputs2, targets2, smooth=1.0)
    assert jnp.allclose(loss2, ref2, rtol=1e-5, atol=1e-5), (loss2, ref2)

    # 3) Tiny tile cap -> exercises the multi-block / ragged-tail / 2-way split
    #    / duplicate-block paths at small size.
    inputs3 = jax.random.normal(k5, (53, 79), dtype=jnp.float32)
    targets3 = (jax.random.uniform(k6, (53, 79)) > 0.5).astype(jnp.float32)
    loss3 = dice_loss(inputs3, targets3, smooth=1.0, tile_cap=8)
    jax.block_until_ready(loss3)
    ref3 = _dice_loss_ref(inputs3, targets3, smooth=1.0)
    assert jnp.allclose(loss3, ref3, rtol=1e-5, atol=1e-5), (loss3, ref3)

    print("KERNEL_OK")
</pallas_src>

<mosaic_0001>
module attributes {stable_mosaic.version = 11 : i64} {
  func.func @_dice_kernel(%arg0: i32, %arg1: i32, %arg2: memref<16x128xf32, #tpu.memory_space<vmem>>, %arg3: memref<16x128xf32, #tpu.memory_space<vmem>>, %arg4: memref<1x2xf32, #tpu.memory_space<smem>>, %arg5: memref<1x128xf32, #tpu.memory_space<vmem>>, %arg6: memref<1x128xf32, #tpu.memory_space<vmem>>) attributes {dimension_semantics = [#tpu.dimension_semantics<parallel>, #tpu.dimension_semantics<arbitrary>], iteration_bounds = array<i64: 1, 1>, scalar_prefetch = 0 : i64, scratch_operands = 2 : i64, tpu.core_type = #tpu.core_type<tc>, window_params = [{transform_indices = @transform_0, window_bounds = array<i64: 16, 128>}, {transform_indices = @transform_1, window_bounds = array<i64: 16, 128>}, {transform_indices = @transform_2, window_bounds = array<i64: 1, 2>}]} {
    %c0_i32 = arith.constant 0 : i32
    %0 = arith.cmpi eq, %arg1, %c0_i32 : i32
    %1 = arith.extui %0 : i1 to i32
    %c0_i32_0 = arith.constant 0 : i32
    %2 = arith.cmpi ne, %1, %c0_i32_0 : i32
    scf.if %2 {
      %cst_16 = arith.constant 0.000000e+00 : f32
      %25 = vector.broadcast %cst_16 : f32 to vector<1x128xf32>
      %c0_17 = arith.constant 0 : index
      %c0_18 = arith.constant 0 : index
      %26 = vector.load %arg5[%c0_17, %c0_18] : memref<1x128xf32, #tpu.memory_space<vmem>>, vector<1x128xf32>
      tpu.vector_store %arg5[%c0_17, %c0_18], %25 {strides = array<i32>} : memref<1x128xf32, #tpu.memory_space<vmem>>, vector<1x128xf32>,
      %cst_19 = arith.constant 0.000000e+00 : f32
      %27 = vector.broadcast %cst_19 : f32 to vector<1x128xf32>
      %c0_20 = arith.constant 0 : index
      %c0_21 = arith.constant 0 : index
      %28 = vector.load %arg6[%c0_20, %c0_21] : memref<1x128xf32, #tpu.memory_space<vmem>>, vector<1x128xf32>
      tpu.vector_store %arg6[%c0_20, %c0_21], %27 {strides = array<i32>} : memref<1x128xf32, #tpu.memory_space<vmem>>, vector<1x128xf32>,
    } else {
    }
    %c0 = arith.constant 0 : index
    %c0_1 = arith.constant 0 : index
    %3 = vector.load %arg2[%c0, %c0_1] : memref<16x128xf32, #tpu.memory_space<vmem>>, vector<16x128xf32>
    %4 = arith.negf %3 : vector<16x128xf32>
    %5 = math.exp %4 : vector<16x128xf32>
    %cst = arith.constant 1.000000e+00 : f32
    %6 = vector.broadcast %cst : f32 to vector<16x128xf32>
    %7 = arith.addf %6, %5 : vector<16x128xf32>
    %8 = arith.divf %6, %7 : vector<16x128xf32>
    %c0_2 = arith.constant 0 : index
    %c0_3 = arith.constant 0 : index
    %9 = vector.load %arg3[%c0_2, %c0_3] : memref<16x128xf32, #tpu.memory_space<vmem>>, vector<16x128xf32>
    %c0_4 = arith.constant 0 : index
    %c0_5 = arith.constant 0 : index
    %10 = vector.load %arg5[%c0_4, %c0_5] : memref<1x128xf32, #tpu.memory_space<vmem>>, vector<1x128xf32>
    %11 = arith.mulf %8, %9 : vector<16x128xf32>
    %cst_6 = arith.constant dense<0.000000e+00> : vector<128xf32>
    %12 = vector.multi_reduction <add>, %11, %cst_6 [0] : vector<16x128xf32> to vector<128xf32>
    %13 = vector.shape_cast %12 : vector<128xf32> to vector<1x128xf32>
    %14 = arith.addf %10, %13 : vector<1x128xf32>
    %c0_7 = arith.constant 0 : index
    %c0_8 = arith.constant 0 : index
    %15 = vector.load %arg5[%c0_7, %c0_8] : memref<1x128xf32, #tpu.memory_space<vmem>>, vector<1x128xf32>
    tpu.vector_store %arg5[%c0_7, %c0_8], %14 {strides = array<i32>} : memref<1x128xf32, #tpu.memory_space<vmem>>, vector<1x128xf32>,
    %c0_9 = arith.constant 0 : index
    %c0_10 = arith.constant 0 : index
    %16 = vector.load %arg6[%c0_9, %c0_10] : memref<1x128xf32, #tpu.memory_space<vmem>>, vector<1x128xf32>
    %17 = arith.addf %8, %9 : vector<16x128xf32>
    %cst_11 = arith.constant dense<0.000000e+00> : vector<128xf32>
    %18 = vector.multi_reduction <add>, %17, %cst_11 [0] : vector<16x128xf32> to vector<128xf32>
    %19 = vector.shape_cast %18 : vector<128xf32> to vector<1x128xf32>
    %20 = arith.addf %16, %19 : vector<1x128xf32>
    %c0_12 = arith.constant 0 : index
    %c0_13 = arith.constant 0 : index
    %21 = vector.load %arg6[%c0_12, %c0_13] : memref<1x128xf32, #tpu.memory_space<vmem>>, vector<1x128xf32>
    tpu.vector_store %arg6[%c0_12, %c0_13], %20 {strides = array<i32>} : memref<1x128xf32, #tpu.memory_space<vmem>>, vector<1x128xf32>,
    %c0_i32_14 = arith.constant 0 : i32
    %22 = arith.cmpi eq, %arg1, %c0_i32_14 : i32
    %23 = arith.extui %22 : i1 to i32
    %c0_i32_15 = arith.constant 0 : i32
    %24 = arith.cmpi ne, %23, %c0_i32_15 : i32
    scf.if %24 {
      %c0_16 = arith.constant 0 : index
      %c0_17 = arith.constant 0 : index
      %25 = vector.load %arg5[%c0_16, %c0_17] : memref<1x128xf32, #tpu.memory_space<vmem>>, vector<1x128xf32>
      %26 = vector.shape_cast %25 : vector<1x128xf32> to vector<1x1x128xf32>
      %cst_18 = arith.constant dense<0.000000e+00> : vector<1xf32>
      %27 = vector.multi_reduction <add>, %26, %cst_18 [1, 2] : vector<1x1x128xf32> to vector<1xf32>
      %28 = vector.shape_cast %27 : vector<1xf32> to vector<1x1x1xf32>
      %29 = vector.extract %28[0, 0, 0] : f32 from vector<1x1x1xf32>
      %c0_19 = arith.constant 0 : index
      %c0_20 = arith.constant 0 : index
      %30 = memref.load %arg4[%c0_19, %c0_20] : memref<1x2xf32, #tpu.memory_space<smem>>
      memref.store %29, %arg4[%c0_19, %c0_20] : memref<1x2xf32, #tpu.memory_space<smem>>
      %c0_21 = arith.constant 0 : index
      %c0_22 = arith.constant 0 : index
      %31 = vector.load %arg6[%c0_21, %c0_22] : memref<1x128xf32, #tpu.memory_space<vmem>>, vector<1x128xf32>
      %32 = vector.shape_cast %31 : vector<1x128xf32> to vector<1x1x128xf32>
      %cst_23 = arith.constant dense<0.000000e+00> : vector<1xf32>
      %33 = vector.multi_reduction <add>, %32, %cst_23 [1, 2] : vector<1x1x128xf32> to vector<1xf32>
      %34 = vector.shape_cast %33 : vector<1xf32> to vector<1x1x1xf32>
      %35 = vector.extract %34[0, 0, 0] : f32 from vector<1x1x1xf32>
      %c0_24 = arith.constant 0 : index
      %c1 = arith.constant 1 : index
      %36 = memref.load %arg4[%c0_24, %c1] : memref<1x2xf32, #tpu.memory_space<smem>>
      memref.store %35, %arg4[%c0_24, %c1] : memref<1x2xf32, #tpu.memory_space<smem>>
    } else {
    }
    return
  }
  func.func @transform_0(%arg0: i32, %arg1: i32) -> (i32, i32) {
    %c1_i32 = arith.constant 1 : i32
    %0 = arith.muli %arg0, %c1_i32 : i32
    %1 = arith.addi %0, %arg1 : i32
    %c0_i32 = arith.constant 0 : i32
    %c0_i32_0 = arith.constant 0 : i32
    return %1, %c0_i32 : i32, i32
  }
  func.func @transform_1(%arg0: i32, %arg1: i32) -> (i32, i32) {
    %c1_i32 = arith.constant 1 : i32
    %0 = arith.muli %arg0, %c1_i32 : i32
    %1 = arith.addi %0, %arg1 : i32
    %c0_i32 = arith.constant 0 : i32
    %c0_i32_0 = arith.constant 0 : i32
    return %1, %c0_i32 : i32, i32
  }
  func.func @transform_2(%arg0: i32, %arg1: i32) -> (i32, i32) {
    %c0_i32 = arith.constant 0 : i32
    %c0_i32_0 = arith.constant 0 : i32
    return %arg0, %c0_i32 : i32, i32
  }
}

</mosaic_0001>

<bundles_post_ra>
// kernel: tpu_custom_call.1
= control target key start
LH: loop header
LB: loop body
LE: loop exit
PB: predicated region body
PF: predicated region fallthrough
CT: control target
= control target key end

     0   :  { %7 = vsyncpa [#allocation5], 0  ;;  %s247_s0 = inlined_call_operand.hbm [shape: f32[16,128], index: 0, kind: input, shape index: {}]   ;;  %s248_s1 = inlined_call_operand.hbm [shape: f32[16,128], index: 1, kind: input, shape index: {}]   ;;  %s249_s2 = inlined_call_operand.hbm [shape: f32[1,2], index: 2, kind: output, shape index: {}]  }
   0x1   :  { %8 = vsyncpa [#allocation8], 0 }
   0x2   :  { %9 = vsyncpa [#allocation6], 0  ;;  %s217_s9 = smov [#allocation4]  }
   0x3   :  { %s19_s10 = sshll.u32 %s217_s9, 4  ;;  %s20_s10 = int_to_ptr.vmem [resolvable:$true] %s19_s10 }
   0x4   :  { %s171_s11 = scalar_lea.vmem %s20_s10, 256  ;;  %p176_p1 = scmp.lt.s32.totalorder %s20_s10, %s20_s10 }
   0x5   :  { %p172_p0 = scmp.ne.s32.totalorder %s20_s10, %s171_s11  ;;  %p177_p2 = scmp.lt.s32.totalorder %s171_s11, %s171_s11 }
   0x7   :  { %p178_p3 = por %p177_p2, %p176_p1 }
   0x9   :  { %p179_p4 = pnand %p178_p3, %p172_p0 }
   0xb   :  { %182 = shalt.err (!%p179_p4)
}
   0xc   :  { %s218_s12 = smov 128   ;;  %s219_s13 = smov 8  }
   0xd   :  { %25 = dma.hbm_to_vmem [thread:$0]  %s247_s0, 256, %s20_s10, [#allocation5], %s218_s12, %s218_s12, %s219_s13  }
   0xe   :  { %s220_s16 = smov [#allocation7]  }
   0xf   :  { %s35_s17 = sshll.u32 %s220_s16, 4  ;;  %s36_s17 = int_to_ptr.vmem [resolvable:$true] %s35_s17 }
  0x10   :  { %s191_s18 = scalar_lea.vmem %s36_s17, 256  ;;  %p196_p6 = scmp.lt.s32.totalorder %s36_s17, %s36_s17 }
  0x11   :  { %p192_p5 = scmp.ne.s32.totalorder %s36_s17, %s191_s18  ;;  %p197_p7 = scmp.lt.s32.totalorder %s191_s18, %s191_s18 }
  0x13   :  { %p198_p8 = por %p197_p7, %p196_p6 }
  0x15   :  { %p199_p9 = pnand %p198_p8, %p192_p5 }
  0x17   :  { %202 = shalt.err (!%p199_p9)
}
  0x18   :  { %41 = dma.hbm_to_vmem [thread:$0]  %s248_s1, 256, %s36_s17, [#allocation8], %s218_s12, %s218_s12, %s219_s13  }
  0x19   :  { %211 = dma.done.wait [#allocation5], 256  }
  0x1a   :  { %212 = vsyncadd [#allocation5], 4294967040 }
  0x1b   :  { %213 = dma.done.wait [#allocation8], 256  }
  0x1c   :  { %214 = vsyncadd [#allocation8], 4294967040  ;;  %v221_v0 = vmov 0.0   ;;  %v58_v1 = vld [vmem:[#allocation4] sm:$0xff]  ;;  %v59_v2 = vld [vmem:[#allocation4 + $0x8] sm:$0xff]  ;;  %vm102_vm0 = vcmask 1040384  }
  0x1d   :  { %56 = vst [vmem:[#allocation2] sm:$0x1] %v221_v0  ;;  %57 = vst [vmem:[#allocation3] sm:$0x1] %v221_v0  ;;  %v143_v3 = vmul.f32 -1.442695, %v58_v1 }
  0x1e   :  { %v144_v4 = vmul.f32 -1.442695, %v59_v2  ;;  %v72_v9 = vld [vmem:[#allocation7] sm:$0xff]  ;;  %v73_v10 = vld [vmem:[#allocation7 + $0x8] sm:$0xff]  ;;  %s222_s21 = smov [#allocation9]  }
  0x1f   :  { %155 = vpow2.f32 %v143_v3 }
  0x20   :  { %157 = vpow2.f32 %v144_v4 }
  0x24   :  { %v74_v29 = vld [vmem:[#allocation2] sm:$0x1]  ;;  %v86_v30 = vld [vmem:[#allocation3] sm:$0x1] }
  0x2c   :  { %v156_v5 = vpop.eup %155 }
  0x2d   :  { %v158_v6 = vpop.eup %157  ;;  %v66_v7 = vadd.f32 1.0, %v156_v5 }
  0x2e   :  { %v67_v8 = vadd.f32 1.0, %v158_v6 }
  0x2f   :  { %159 = vrcp.f32 %v66_v7 }
  0x30   :  { %161 = vrcp.f32 %v67_v8 }
  0x3c   :  { %v160_v11 = vpop.eup %159 }
  0x3d   :  { %v162_v12 = vpop.eup %161  ;;  %v75_v13 = vmul.f32 %v160_v11, %v72_v9  ;;  %v87_v14 = vadd.f32 %v160_v11, %v72_v9 }
  0x3e   :  { %v76_v15 = vmul.f32 %v162_v12, %v73_v10  ;;  %v88_v16 = vadd.f32 %v162_v12, %v73_v10 }
  0x40   :  { %v77_v17 = vadd.f32 %v76_v15, %v75_v13  ;;  %v89_v18 = vadd.f32 %v88_v16, %v87_v14 }
  0x42   :  { %v78_v19 = vrot.slane %v77_v17, 4  ;;  %v90_v20 = vrot.slane %v89_v18, 4 }
  0x44   :  { %v79_v21 = vadd.f32 %v78_v19, %v77_v17  ;;  %v91_v22 = vadd.f32 %v90_v20, %v89_v18 }
  0x46   :  { %v80_v23 = vrot.slane %v79_v21, 2  ;;  %v92_v24 = vrot.slane %v91_v22, 2 }
  0x48   :  { %v81_v25 = vadd.f32 %v80_v23, %v79_v21  ;;  %v93_v26 = vadd.f32 %v92_v24, %v91_v22 }
  0x4a   :  { %v82_v27 = vrot.slane %v81_v25, 1  ;;  %v94_v28 = vrot.slane %v93_v26, 1 }
  0x4c   :  { %v83_v31 = vadd.f32 %v82_v27, %v81_v25  ;;  %v95_v32 = vadd.f32 %v94_v28, %v93_v26 }
  0x4e   :  { %v84_v33 = vadd.f32 %v83_v31, %v74_v29  ;;  %v96_v34 = vadd.f32 %v95_v32, %v86_v30 }
  0x50   :  { %85 = vst [vmem:[#allocation2] sm:$0x1] %v84_v33  ;;  %97 = vst [vmem:[#allocation3] sm:$0x1] %v96_v34 }
  0x57   :  { %v101_v35 = vld [vmem:[#allocation2] sm:$0x1]  ;;  %v115_v36 = vld [vmem:[#allocation3] sm:$0x1] }
  0x58   :  { %v103_v37 = vsel %vm102_vm0, %v101_v35, 0.0  ;;  %v116_v38 = vsel %vm102_vm0, %v115_v36, 0.0 }
  0x59   :  { %104 = vadd.xlane.f32.xlu0 %v103_v37 }
  0x5d   :  { %117 = vadd.xlane.f32.xlu0 %v116_v38 }
  0xe2   :  { %v105_v39 = vpop.xlane.xlu0 %104 }
  0xe3   :  { %v106_v40 = vrot.slane %v105_v39, 4 }
  0xe5   :  { %v107_v41 = vadd.f32 %v106_v40, %v105_v39 }
  0xe6   :  { %v118_v42 = vpop.xlane.xlu0 %117 }
  0xe7   :  { %v108_v43 = vrot.slane %v107_v41, 2  ;;  %v119_v44 = vrot.slane %v118_v42, 4 }
  0xe9   :  { %v120_v45 = vadd.f32 %v119_v44, %v118_v42  ;;  %v109_v46 = vadd.f32 %v108_v43, %v107_v41 }
  0xeb   :  { %v121_v47 = vrot.slane %v120_v45, 2  ;;  %v110_v48 = vrot.slane %v109_v46, 1 }
  0xed   :  { %v122_v49 = vadd.f32 %v121_v47, %v120_v45  ;;  %v111_v50 = vadd.f32 %v110_v48, %v109_v46 }
  0xef   :  { %145 = vpush %v111_v50  ;;  %v123_v51 = vrot.slane %v122_v49, 1 }
  0xf1   :  { %v124_v52 = vadd.f32 %v123_v51, %v122_v49 }
  0xf3   :  { %147 = vpush %v124_v52 }
 0x120   :  { %s146_s0 = spop %145 }
 0x121   :  { %114 = sst [smem:[#allocation9]] %s146_s0 }
 0x124   :  { %s148_s1 = spop %147 }
 0x125   :  { %127 = sst [smem:[#allocation9 + $0x1]] %s148_s1 }
 0x126   :  { %135 = dma.smem_to_hbm %s222_s21, 16, %s249_s2, [#allocation6]  }
 0x127   :  { %215 = dma.done.wait [#allocation6], 16  }
 0x128   :  { %216 = vsyncadd [#allocation6], 4294967280 }
 0x129   :  { %139 = sfence }
 0x12a   :  { %140 = vsyncpa [#allocation5], 1 }
 0x12b   :  { %141 = vsyncpa [#allocation8], 1 }
 0x12c   :  { %142 = vsyncpa [#allocation6], 1 }

</bundles_post_ra>
